<compile_context>
chip_gen: v7x
topology: tpu7x:2x2x1
jax: 0.10.0
libtpu: 0.0.40
codegen_flags: <defaults>
</compile_context>

<pallas_src>
import math

import jax
import jax.numpy as jnp
from jax.experimental import pallas as pl
from jax.experimental.pallas import tpu as pltpu


def _x_update_shared_kernel(rho_ref, x1_ref, x2_ref, m_ref, out_ref):
    """Shared AtA_fft: the whole update is ONE (TB,HW)@(HW,HW) MXU matmul."""
    rho1 = rho_ref[0]
    rho2 = rho_ref[1]
    num = rho1 * x1_ref[...] + rho2 * x2_ref[...]
    out_ref[...] = jnp.dot(num, m_ref[...],
                           preferred_element_type=jnp.float32).astype(out_ref.dtype)


def _x_update_kernel(rho_ref, x1_ref, x2_ref, inv_ref, gr_ref, gi_ref, out_ref):
    """Per-plane AtA_fft: fused forward DFT (Re/Im), scale, inverse DFT (real)."""
    rho1 = rho_ref[0]
    rho2 = rho_ref[1]
    num = rho1 * x1_ref[...] + rho2 * x2_ref[...]            # (TB, HW)

    # forward 2-D DFT via the fused Kronecker factors (two MXU matmuls)
    sr = jnp.dot(num, gr_ref[...], preferred_element_type=jnp.float32)
    si = jnp.dot(num, gi_ref[...], preferred_element_type=jnp.float32)

    # d already contains 1/(HW * (rho1*AtA + rho2)); no concat/broadcast copies
    d = inv_ref[...]
    out_ref[...] = (
        jnp.dot(sr * d, gr_ref[...], preferred_element_type=jnp.float32)
        + jnp.dot(si * d, gi_ref[...], preferred_element_type=jnp.float32)
    ).astype(out_ref.dtype)


def _kron_dft_parts(H, W):
    """Real/imag parts of G = F_H (x) F_W for row-major flattened planes."""
    def cos_sin(n):
        k = jnp.arange(n, dtype=jnp.float32)
        theta = (-2.0 * math.pi / float(n)) * jnp.outer(k, k)
        return jnp.cos(theta), jnp.sin(theta)

    ch, sh = cos_sin(H)
    cw, sw = cos_sin(W)
    gr = jnp.kron(ch, cw) - jnp.kron(sh, sw)                  # (HW, HW)
    gi = jnp.kron(ch, sw) + jnp.kron(sh, cw)                  # (HW, HW)
    return gr, gi


def _pick_tb(bc):
    """~MXU row count, capped at 256, aiming for >= 2 grid steps (v7x: 2 TCs)."""
    if bc <= 8:
        return bc                      # block dim == full array dim (allowed)
    half = -(-bc // 2)
    return max(8, min(256, 8 * (-(-half // 8))))


def x_update(x1, x2, ata_fft, rho1, rho2, *, tb=None):
    """Pallas implementation of X_Update.forward.

    x1, x2: (B, C, H, W); ata_fft broadcastable to (B, C, H, W); rho1/rho2 scalars.
    Returns (B, C, H, W) float32 (the .real of the ifft).
    """
    B, C, H, W = x1.shape
    BC, HW = B * C, H * W
    # TODO(synk): for HW >= ~1024 replace the dense (HW,HW) Kronecker factors with
    # the separable per-row / per-column transform (factor memory grows as (H*W)^2).

    x1f = x1.reshape(BC, HW).astype(jnp.float32)
    x2f = x2.reshape(BC, HW).astype(jnp.float32)
    ata = jnp.asarray(ata_fft, jnp.float32)
    shared = ata.size == HW                      # AtA_fft shared across (B, C)?

    gr, gi = _kron_dft_parts(H, W)
    rho = jnp.stack([jnp.asarray(rho1, jnp.float32),
                     jnp.asarray(rho2, jnp.float32)])

    if tb is None:
        tb = _pick_tb(BC)
    nb = -(-BC // tb)                            # ragged last block: no pad copy;
                                                 # padded rows are independent and
                                                 # never written past BC.

    plane_spec = pl.BlockSpec((tb, HW), lambda i: (i, 0))
    const_2d = lambda i: (0, 0)
    smem_spec = pl.BlockSpec(memory_space=pltpu.MemorySpace.SMEM)
    blk_bytes = tb * HW * 4

    if shared:
        # Fold 1/(rho1*AtA+rho2) and the 1/HW ifft normalization into a single
        # composite real matrix M, so the kernel is one matmul per block.
        d = (1.0 / (rho1 * ata + rho2)).reshape(1, HW)
        hi = jax.lax.Precision.HIGHEST
        m = (jnp.dot(gr * d, gr, precision=hi)
             + jnp.dot(gi * d, gi, precision=hi)) / float(HW)

        est = HW * HW * 4 + 2 * 3 * blk_bytes            # M + x1/x2/out (2-buf)
        vmem_limit = int(min(64 << 20, max(2 * est, 32 << 20)))

        out = pl.pallas_call(
            _x_update_shared_kernel,
            out_shape=jax.ShapeDtypeStruct((BC, HW), jnp.float32),
            grid=(nb,),
            in_specs=[
                smem_spec,                                   # [rho1, rho2]
                plane_spec,                                  # x1
                plane_spec,                                  # x2
                pl.BlockSpec((HW, HW), const_2d,
                             pipeline_mode=pl.Buffered(1)),  # composite M
            ],
            out_specs=plane_spec,
            compiler_params=pltpu.CompilerParams(
                dimension_semantics=("parallel",),
                vmem_limit_bytes=vmem_limit),
        )(rho, x1f, x2f, m)
    else:
        if ata.shape != (B, C, H, W):
            # TODO(synk): for partially-broadcast AtA_fft (e.g. (B,1,H,W)) select the
            # compact plane via the index_map instead of materializing the broadcast.
            ata = jnp.broadcast_to(ata, (B, C, H, W))
        # 1/HW ifft normalization folded into the precomputed inverse.
        invf = (1.0 / ((rho1 * ata + rho2) * float(HW))).reshape(BC, HW)

        est = 2 * HW * HW * 4 + 2 * 4 * blk_bytes        # Gr,Gi + x1/x2/inv/out
        vmem_limit = int(min(64 << 20, max(2 * est, 32 << 20)))

        out = pl.pallas_call(
            _x_update_kernel,
            out_shape=jax.ShapeDtypeStruct((BC, HW), jnp.float32),
            grid=(nb,),
            in_specs=[
                smem_spec,                                   # [rho1, rho2]
                plane_spec,                                  # x1
                plane_spec,                                  # x2
                plane_spec,                                  # 1/(HW*(rho1*AtA+rho2))
                pl.BlockSpec((HW, HW), const_2d,
                             pipeline_mode=pl.Buffered(1)),  # Gr
                pl.BlockSpec((HW, HW), const_2d,
                             pipeline_mode=pl.Buffered(1)),  # Gi
            ],
            out_specs=plane_spec,
            compiler_params=pltpu.CompilerParams(
                dimension_semantics=("parallel",),
                vmem_limit_bytes=vmem_limit),
        )(rho, x1f, x2f, invf, gr, gi)

    return out.reshape(B, C, H, W)


def _x_update_ref(x1, x2, ata_fft, rho1, rho2):
    """Pure-JAX reference mirroring the PyTorch forward."""
    lhs = rho1 * ata_fft + rho2
    rhs = jnp.fft.fftn(rho1 * x1 + rho2 * x2, axes=(2, 3))
    x = jnp.fft.ifftn(rhs / lhs, axes=(2, 3))
    return jnp.real(x)


if __name__ == "__main__":
    B, C, H, W = 2, 4, 16, 16
    key = jax.random.PRNGKey(0)
    k1, k2, k3, k4 = jax.random.split(key, 4)

    x1 = jax.random.normal(k1, (B, C, H, W), dtype=jnp.float32)
    x2 = jax.random.normal(k2, (B, C, H, W), dtype=jnp.float32)
    # AtA_fft is real and strictly positive (e.g. |FFT(blur kernel)|^2).
    ata_full = jax.random.uniform(k3, (B, C, H, W), dtype=jnp.float32,
                                  minval=0.1, maxval=2.0)
    ata_shared = jax.random.uniform(k4, (H, W), dtype=jnp.float32,
                                    minval=0.1, maxval=2.0)
    rho1, rho2 = 0.7, 1.3

    # Per-plane AtA_fft path.
    out = jax.block_until_ready(x_update(x1, x2, ata_full, rho1, rho2))
    ref = jax.block_until_ready(_x_update_ref(x1, x2, ata_full, rho1, rho2))
    err = float(jnp.max(jnp.abs(out - ref)))
    assert out.shape == (B, C, H, W)
    assert err < 1e-3, f"per-plane path: max abs error too large: {err}"

    # Shared AtA_fft fast path (single composite-matrix matmul).
    out_s = jax.block_until_ready(x_update(x1, x2, ata_shared, rho1, rho2))
    ref_s = jax.block_until_ready(_x_update_ref(x1, x2, ata_shared, rho1, rho2))
    err_s = float(jnp.max(jnp.abs(out_s - ref_s)))
    assert out_s.shape == (B, C, H, W)
    assert err_s < 1e-3, f"shared path: max abs error too large: {err_s}"

    print("KERNEL_OK")
</pallas_src>

<mosaic_0001>
module attributes {stable_mosaic.version = 11 : i64} {
  func.func @_x_update_kernel(%arg0: i32, %arg1: memref<2xf32, #tpu.memory_space<smem>>, %arg2: memref<8x256xf32, #tpu.memory_space<vmem>>, %arg3: memref<8x256xf32, #tpu.memory_space<vmem>>, %arg4: memref<8x256xf32, #tpu.memory_space<vmem>>, %arg5: memref<256x256xf32, #tpu.memory_space<vmem>>, %arg6: memref<256x256xf32, #tpu.memory_space<vmem>>, %arg7: memref<8x256xf32, #tpu.memory_space<vmem>>) attributes {dimension_semantics = [#tpu.dimension_semantics<parallel>], iteration_bounds = array<i64: 1>, scalar_prefetch = 0 : i64, scratch_operands = 0 : i64, tpu.core_type = #tpu.core_type<tc>, window_params = [{transform_indices = @transform_0, window_bounds = array<i64: 2>}, {transform_indices = @transform_1, window_bounds = array<i64: 8, 256>}, {transform_indices = @transform_2, window_bounds = array<i64: 8, 256>}, {transform_indices = @transform_3, window_bounds = array<i64: 8, 256>}, {pipeline_mode = #tpu.pipeline_mode<synchronous>, transform_indices = @transform_4, window_bounds = array<i64: 256, 256>}, {pipeline_mode = #tpu.pipeline_mode<synchronous>, transform_indices = @transform_5, window_bounds = array<i64: 256, 256>}, {transform_indices = @transform_6, window_bounds = array<i64: 8, 256>}]} {
    %c0 = arith.constant 0 : index
    %0 = memref.load %arg1[%c0] : memref<2xf32, #tpu.memory_space<smem>>
    %c1 = arith.constant 1 : index
    %1 = memref.load %arg1[%c1] : memref<2xf32, #tpu.memory_space<smem>>
    %c0_0 = arith.constant 0 : index
    %c0_1 = arith.constant 0 : index
    %2 = vector.load %arg2[%c0_0, %c0_1] : memref<8x256xf32, #tpu.memory_space<vmem>>, vector<8x256xf32>
    %3 = vector.broadcast %0 : f32 to vector<8x256xf32>
    %4 = arith.mulf %3, %2 : vector<8x256xf32>
    %c0_2 = arith.constant 0 : index
    %c0_3 = arith.constant 0 : index
    %5 = vector.load %arg3[%c0_2, %c0_3] : memref<8x256xf32, #tpu.memory_space<vmem>>, vector<8x256xf32>
    %6 = vector.broadcast %1 : f32 to vector<8x256xf32>
    %7 = arith.mulf %6, %5 : vector<8x256xf32>
    %8 = arith.addf %4, %7 : vector<8x256xf32>
    %c0_4 = arith.constant 0 : index
    %c0_5 = arith.constant 0 : index
    %9 = vector.load %arg5[%c0_4, %c0_5] : memref<256x256xf32, #tpu.memory_space<vmem>>, vector<256x256xf32>
    %cst = arith.constant dense<0.000000e+00> : vector<8x256xf32>
    %10 = tpu.matmul %8, %9, %cst {dimension_numbers = #tpu.dot_dimension_numbers<[1], [0], [0], [1], [0, 0, 1, 1], [], []>} : vector<8x256xf32>, vector<256x256xf32>, vector<8x256xf32> -> vector<8x256xf32>
    %c0_6 = arith.constant 0 : index
    %c0_7 = arith.constant 0 : index
    %11 = vector.load %arg6[%c0_6, %c0_7] : memref<256x256xf32, #tpu.memory_space<vmem>>, vector<256x256xf32>
    %cst_8 = arith.constant dense<0.000000e+00> : vector<8x256xf32>
    %12 = tpu.matmul %8, %11, %cst_8 {dimension_numbers = #tpu.dot_dimension_numbers<[1], [0], [0], [1], [0, 0, 1, 1], [], []>} : vector<8x256xf32>, vector<256x256xf32>, vector<8x256xf32> -> vector<8x256xf32>
    %c0_9 = arith.constant 0 : index
    %c0_10 = arith.constant 0 : index
    %13 = vector.load %arg4[%c0_9, %c0_10] : memref<8x256xf32, #tpu.memory_space<vmem>>, vector<8x256xf32>
    %14 = arith.mulf %10, %13 : vector<8x256xf32>
    %c0_11 = arith.constant 0 : index
    %c0_12 = arith.constant 0 : index
    %15 = vector.load %arg5[%c0_11, %c0_12] : memref<256x256xf32, #tpu.memory_space<vmem>>, vector<256x256xf32>
    %cst_13 = arith.constant dense<0.000000e+00> : vector<8x256xf32>
    %16 = tpu.matmul %14, %15, %cst_13 {dimension_numbers = #tpu.dot_dimension_numbers<[1], [0], [0], [1], [0, 0, 1, 1], [], []>} : vector<8x256xf32>, vector<256x256xf32>, vector<8x256xf32> -> vector<8x256xf32>
    %17 = arith.mulf %12, %13 : vector<8x256xf32>
    %c0_14 = arith.constant 0 : index
    %c0_15 = arith.constant 0 : index
    %18 = vector.load %arg6[%c0_14, %c0_15] : memref<256x256xf32, #tpu.memory_space<vmem>>, vector<256x256xf32>
    %cst_16 = arith.constant dense<0.000000e+00> : vector<8x256xf32>
    %19 = tpu.matmul %17, %18, %cst_16 {dimension_numbers = #tpu.dot_dimension_numbers<[1], [0], [0], [1], [0, 0, 1, 1], [], []>} : vector<8x256xf32>, vector<256x256xf32>, vector<8x256xf32> -> vector<8x256xf32>
    %20 = arith.addf %16, %19 : vector<8x256xf32>
    %c0_17 = arith.constant 0 : index
    %c0_18 = arith.constant 0 : index
    %21 = vector.load %arg7[%c0_17, %c0_18] : memref<8x256xf32, #tpu.memory_space<vmem>>, vector<8x256xf32>
    tpu.vector_store %arg7[%c0_17, %c0_18], %20 {strides = array<i32>} : memref<8x256xf32, #tpu.memory_space<vmem>>, vector<8x256xf32>,
    return
  }
  func.func @transform_0(%arg0: i32) -> i32 {
    %c0_i32 = arith.constant 0 : i32
    %c0_i32_0 = arith.constant 0 : i32
    return %c0_i32 : i32
  }
  func.func @transform_1(%arg0: i32) -> (i32, i32) {
    %c0_i32 = arith.constant 0 : i32
    %c0_i32_0 = arith.constant 0 : i32
    return %arg0, %c0_i32 : i32, i32
  }
  func.func @transform_2(%arg0: i32) -> (i32, i32) {
    %c0_i32 = arith.constant 0 : i32
    %c0_i32_0 = arith.constant 0 : i32
    return %arg0, %c0_i32 : i32, i32
  }
  func.func @transform_3(%arg0: i32) -> (i32, i32) {
    %c0_i32 = arith.constant 0 : i32
    %c0_i32_0 = arith.constant 0 : i32
    return %arg0, %c0_i32 : i32, i32
  }
  func.func @transform_4(%arg0: i32) -> (i32, i32) {
    %c0_i32 = arith.constant 0 : i32
    %c0_i32_0 = arith.constant 0 : i32
    %c0_i32_1 = arith.constant 0 : i32
    return %c0_i32, %c0_i32_0 : i32, i32
  }
  func.func @transform_5(%arg0: i32) -> (i32, i32) {
    %c0_i32 = arith.constant 0 : i32
    %c0_i32_0 = arith.constant 0 : i32
    %c0_i32_1 = arith.constant 0 : i32
    return %c0_i32, %c0_i32_0 : i32, i32
  }
  func.func @transform_6(%arg0: i32) -> (i32, i32) {
    %c0_i32 = arith.constant 0 : i32
    %c0_i32_0 = arith.constant 0 : i32
    return %arg0, %c0_i32 : i32, i32
  }
}

</mosaic_0001>

<bundles_post_ra>
// kernel: tpu_custom_call.1
= control target key start
LH: loop header
LB: loop body
LE: loop exit
PB: predicated region body
PF: predicated region fallthrough
CT: control target
= control target key end

     0   :  { %11 = vsyncpa [#allocation5], 0  ;;  %s1344_s0 = inlined_call_operand.hbm [shape: f32[2], index: 0, kind: input, shape index: {}]   ;;  %s1345_s1 = inlined_call_operand.hbm [shape: f32[8,256], index: 1, kind: input, shape index: {}]   ;;  %s1346_s2 = inlined_call_operand.hbm [shape: f32[8,256], index: 2, kind: input, shape index: {}]   ;;  %s1347_s3 = inlined_call_operand.hbm [shape: f32[8,256], index: 3, kind: input, shape index: {}]   ;;  %s1348_s4 = inlined_call_operand.hbm [shape: f32[256,256], index: 4, kind: input, shape index: {}]   ;;  %s1349_s5 = inlined_call_operand.hbm [shape: f32[256,256], index: 5, kind: input, shape index: {}]   ;;  %s1350_s6 = inlined_call_operand.hbm [shape: f32[8,256], index: 6, kind: output, shape index: {}]  }
   0x1   :  { %12 = vsyncpa [#allocation3], 0 }
   0x2   :  { %13 = vsyncpa [#allocation8], 0 }
   0x3   :  { %14 = vsyncpa [#allocation11], 0 }
   0x4   :  { %15 = vsyncpa [#allocation4], 0  ;;  %s969_s21 = smov [#allocation7]   ;;  %s970_s23 = smov [#allocation10]  }
   0x5   :  { %s40_s22 = sshll.u32 %s969_s21, 4  ;;  %s59_s24 = sshll.u32 %s970_s23, 4  ;;  %s41_s22 = int_to_ptr.vmem [resolvable:$true] %s40_s22  ;;  %s1013_s24 = int_to_ptr.vmem [resolvable:$true] %s59_s24 }
   0x6   :  { %s817_s27 = scalar_lea.hbm %s1346_s2, 256 }
   0x7   :  { %p818_p0 = scmp.ne.s32.totalorder %s1346_s2, %s817_s27  ;;  %p821_p1 = scmp.lt.u32.totalorder %s817_s27, %s1346_s2 }
   0x9   :  { %p823_p2 = pnand %p821_p1, %p818_p0 }
   0xb   :  { %826 = shalt.err (!%p823_p2)
}
   0xc   :  { %s827_s8 = scalar_lea.vmem %s41_s22, 256  ;;  %p832_p4 = scmp.lt.s32.totalorder %s41_s22, %s41_s22 }
   0xd   :  { %p828_p3 = scmp.ne.s32.totalorder %s41_s22, %s827_s8  ;;  %p833_p5 = scmp.lt.s32.totalorder %s827_s8, %s827_s8 }
   0xf   :  { %p834_p6 = por %p833_p5, %p832_p4 }
  0x11   :  { %p835_p7 = pnand %p834_p6, %p828_p3 }
  0x13   :  { %838 = shalt.err (!%p835_p7)
}
  0x14   :  { %43 = dma.hbm_to_vmem [thread:$0]  %s1346_s2, 256, %s41_s22, [#allocation8]  }
  0x15   :  { %s839_s13 = scalar_lea.hbm %s1348_s4, 8192 }
  0x16   :  { %p840_p8 = scmp.ne.s32.totalorder %s1348_s4, %s839_s13  ;;  %p843_p9 = scmp.lt.u32.totalorder %s839_s13, %s1348_s4 }
  0x18   :  { %p845_p10 = pnand %p843_p9, %p840_p8 }
  0x1a   :  { %848 = shalt.err (!%p845_p10)
}
  0x1b   :  { %s849_s18 = scalar_lea.vmem %s1013_s24, 8192  ;;  %p854_p12 = scmp.lt.s32.totalorder %s1013_s24, %s1013_s24 }
  0x1c   :  { %p850_p11 = scmp.ne.s32.totalorder %s1013_s24, %s849_s18  ;;  %p855_p13 = scmp.lt.s32.totalorder %s849_s18, %s849_s18 }
  0x1e   :  { %p856_p0 = por %p855_p13, %p854_p12 }
  0x20   :  { %p857_p1 = pnand %p856_p0, %p850_p11 }
  0x22   :  { %860 = shalt.err (!%p857_p1)
}
  0x23   :  { %s971_s2 = smov 256   ;;  %s972_s19 = smov 16  }
  0x24   :  { %65 = dma.hbm_to_vmem [thread:$0]  %s1348_s4, 8192, %s1013_s24, [#allocation11], %s971_s2, %s971_s2, %s972_s19  }
  0x25   :  { %s861_s25 = scalar_lea.hbm %s1344_s0, 16 }
  0x26   :  { %p862_p2 = scmp.ne.s32.totalorder %s1344_s0, %s861_s25  ;;  %p865_p3 = scmp.lt.u32.totalorder %s861_s25, %s1344_s0 }
  0x28   :  { %p867_p4 = pnand %p865_p3, %p862_p2 }
  0x2a   :  { %870 = shalt.err (!%p867_p4)
}
  0x2b   :  { %s973_s30 = smov [#allocation2]   ;;  %s974_s4 = smov [#allocation6]  }
  0x2c   :  { %23 = dma.hbm_to_smem %s1344_s0, 16, %s973_s30, [#allocation5]  }
  0x2d   :  { %s30_s24 = sshll.u32 %s974_s4, 4  ;;  %s975_s9 = smov [#allocation9]   ;;  %s31_s24 = int_to_ptr.vmem [resolvable:$true] %s30_s24 }
  0x2e   :  { %s50_s10 = sshll.u32 %s975_s9, 4  ;;  %s871_s13 = scalar_lea.hbm %s1345_s1, 256  ;;  %s51_s10 = int_to_ptr.vmem [resolvable:$true] %s50_s10 }
  0x2f   :  { %p872_p5 = scmp.ne.s32.totalorder %s1345_s1, %s871_s13  ;;  %p875_p6 = scmp.lt.u32.totalorder %s871_s13, %s1345_s1 }
  0x31   :  { %p877_p7 = pnand %p875_p6, %p872_p5 }
  0x33   :  { %880 = shalt.err (!%p877_p7)
}
  0x34   :  { %s881_s0 = scalar_lea.vmem %s31_s24, 256  ;;  %p886_p9 = scmp.lt.s32.totalorder %s31_s24, %s31_s24 }
  0x35   :  { %p882_p8 = scmp.ne.s32.totalorder %s31_s24, %s881_s0  ;;  %p887_p10 = scmp.lt.s32.totalorder %s881_s0, %s881_s0 }
  0x37   :  { %p888_p11 = por %p887_p10, %p886_p9 }
  0x39   :  { %p889_p12 = pnand %p888_p11, %p882_p8 }
  0x3b   :  { %892 = shalt.err (!%p889_p12)
}
  0x3c   :  { %33 = dma.hbm_to_vmem [thread:$0]  %s1345_s1, 256, %s31_s24, [#allocation3]  }
  0x3d   :  { %s893_s23 = scalar_lea.hbm %s1347_s3, 256 }
  0x3e   :  { %p894_p13 = scmp.ne.s32.totalorder %s1347_s3, %s893_s23  ;;  %p897_p0 = scmp.lt.u32.totalorder %s893_s23, %s1347_s3 }
  0x40   :  { %p899_p1 = pnand %p897_p0, %p894_p13 }
  0x42   :  { %902 = shalt.err (!%p899_p1)
}
  0x43   :  { %s903_s29 = scalar_lea.vmem %s51_s10, 256  ;;  %p908_p3 = scmp.lt.s32.totalorder %s51_s10, %s51_s10 }
  0x44   :  { %p904_p2 = scmp.ne.s32.totalorder %s51_s10, %s903_s29  ;;  %p909_p4 = scmp.lt.s32.totalorder %s903_s29, %s903_s29 }
  0x46   :  { %p910_p5 = por %p909_p4, %p908_p3 }
  0x48   :  { %p911_p6 = pnand %p910_p5, %p904_p2 }
  0x4a   :  { %914 = shalt.err (!%p911_p6)
}
  0x4b   :  { %53 = dma.hbm_to_vmem [thread:$0]  %s1347_s3, 256, %s51_s10, [#allocation8]  }
  0x4c   :  { %s976_s7 = smov [#allocation12]   ;;  %s915_s9 = scalar_lea.hbm %s1349_s5, 8192 }
  0x4d   :  { %s71_s8 = sshll.u32 %s976_s7, 4  ;;  %p916_p7 = scmp.ne.s32.totalorder %s1349_s5, %s915_s9  ;;  %s72_s8 = int_to_ptr.vmem [resolvable:$true] %s71_s8 }
  0x4e   :  { %p919_p8 = scmp.lt.u32.totalorder %s915_s9, %s1349_s5 }
  0x50   :  { %p921_p9 = pnand %p919_p8, %p916_p7 }
  0x52   :  { %924 = shalt.err (!%p921_p9)
}
  0x53   :  { %s925_s15 = scalar_lea.vmem %s72_s8, 8192  ;;  %p930_p11 = scmp.lt.s32.totalorder %s72_s8, %s72_s8 }
  0x54   :  { %p926_p10 = scmp.ne.s32.totalorder %s72_s8, %s925_s15  ;;  %p931_p12 = scmp.lt.s32.totalorder %s925_s15, %s925_s15 }
  0x56   :  { %p932_p13 = por %p931_p12, %p930_p11 }
  0x58   :  { %p933_p0 = pnand %p932_p13, %p926_p10 }
  0x5a   :  { %936 = shalt.err (!%p933_p0)
}
  0x5b   :  { %77 = dma.hbm_to_vmem [thread:$0]  %s1349_s5, 8192, %s72_s8, [#allocation11], %s971_s2, %s971_s2, %s972_s19  }
  0x5c   :  { %959 = dma.done.wait [#allocation5], 16  }
  0x5d   :  { %960 = vsyncadd [#allocation5], 4294967280 }
  0x5e   :  { %961 = dma.done.wait [#allocation3], 256  }
  0x5f   :  { %962 = vsyncadd [#allocation3], 4294967040 }
  0x60   :  { %963 = dma.done.wait [#allocation8], 512  }
  0x61   :  { %964 = vsyncadd [#allocation8], 4294966784 }
  0x62   :  { %965 = dma.done.wait [#allocation11], 16384  }
  0x63   :  { %966 = vsyncadd [#allocation11], 4294950912 }
  0x64   :  { %96 = sfence }
  0x65   :  { %v112_v0 = vld [vmem:[#allocation10 + $0x8] sm:$0xff]  ;;  %v114_v1 = vld [vmem:[#allocation10 + $0x18] sm:$0xff]  ;;  %v111_v2 = vld [vmem:[#allocation10] sm:$0xff]  ;;  %s1117_s5 = sld [smem:[#allocation2]]  ;;  %s1122_s2 = sld [smem:[#allocation2 + $0x1]] }
  0x66   :  { %v1098_v3 = vpack.c.bf16 %v114_v1, %v112_v0  ;;  %v113_v4 = vld [vmem:[#allocation10 + $0x10] sm:$0xff]  ;;  %v116_v5 = vld [vmem:[#allocation10 + $0x28] sm:$0xff]  ;;  %v118_v6 = vld [vmem:[#allocation10 + $0x38] sm:$0xff]  ;;  %s977_s19 = smov [#allocation13]  }
  0x67   :  { %v1100_v7 = vpack.c.bf16 %v113_v4, %v111_v2  ;;  %v1102_v8 = vpack.c.bf16 %v118_v6, %v116_v5  ;;  %v115_v9 = vld [vmem:[#allocation10 + $0x20] sm:$0xff]  ;;  %v117_v10 = vld [vmem:[#allocation10 + $0x30] sm:$0xff]  ;;  %v120_v11 = vld [vmem:[#allocation10 + $0x48] sm:$0xff]  ;;  %s537_s16 = sshll.u32 %s977_s19, 4  ;;  %s538_s16 = int_to_ptr.vmem [resolvable:$true] %s537_s16 }
  0x68   :  { %551 = vmatprep.subr.bf16.mxu1 %v1098_v3  ;;  %v122_v12 = vld [vmem:[#allocation10 + $0x58] sm:$0xff]  ;;  %v1106_v13 = vpack.c.bf16 %v117_v10, %v115_v9  ;;  %v119_v15 = vld [vmem:[#allocation10 + $0x40] sm:$0xff]  ;;  %v121_v16 = vld [vmem:[#allocation10 + $0x50] sm:$0xff]  ;;  %s937_s17 = scalar_lea.vmem %s538_s16, 256  ;;  %p942_p2 = scmp.lt.s32.totalorder %s538_s16, %s538_s16 }
  0x69   :  { %553 = vmatpush1.bf16.msra.mxu1 %v1100_v7  ;;  %v1109_v14 = vpack.c.bf16 %v122_v12, %v120_v11  ;;  %v124_v17 = vld [vmem:[#allocation10 + $0x68] sm:$0xff]  ;;  %v126_v18 = vld [vmem:[#allocation10 + $0x78] sm:$0xff]  ;;  %v1112_v19 = vpack.c.bf16 %v121_v16, %v119_v15  ;;  %v123_v21 = vld [vmem:[#allocation10 + $0x60] sm:$0xff]  ;;  %p938_p1 = scmp.ne.s32.totalorder %s538_s16, %s937_s17  ;;  %p943_p3 = scmp.lt.s32.totalorder %s937_s17, %s937_s17 }
  0x6a   :  { %555 = vmatprep.subr.bf16.mxu1 %v1102_v8  ;;  %v1115_v20 = vpack.c.bf16 %v126_v18, %v124_v17  ;;  %v125_v22 = vld [vmem:[#allocation10 + $0x70] sm:$0xff]  ;;  %v128_v23 = vld [vmem:[#allocation10 + $0x88] sm:$0xff]  ;;  %v130_v24 = vld [vmem:[#allocation10 + $0x98] sm:$0xff] }
  0x6b   :  { %v1120_v25 = vpack.c.bf16 %v125_v22, %v123_v21  ;;  %v1125_v26 = vpack.c.bf16 %v130_v24, %v128_v23  ;;  %v127_v27 = vld [vmem:[#allocation10 + $0x80] sm:$0xff]  ;;  %v129_v28 = vld [vmem:[#allocation10 + $0x90] sm:$0xff]  ;;  %v132_v29 = vld [vmem:[#allocation10 + $0xa8] sm:$0xff]  ;;  %v1352_v37 = vstv %s1117_s5  ;;  %v1351_v40 = vstv %s1122_s2  ;;  %p944_p4 = por %p943_p3, %p942_p2 }
  0x6c   :  { %v134_v30 = vld [vmem:[#allocation10 + $0xb8] sm:$0xff]  ;;  %v1128_v31 = vpack.c.bf16 %v129_v28, %v127_v27  ;;  %v131_v33 = vld [vmem:[#allocation10 + $0xa0] sm:$0xff]  ;;  %v133_v34 = vld [vmem:[#allocation10 + $0xb0] sm:$0xff] }
  0x6d   :  { %557 = vmatpush1.bf16.msra.mxu1 %v1106_v13  ;;  %v1131_v32 = vpack.c.bf16 %v134_v30, %v132_v29  ;;  %v136_v35 = vld [vmem:[#allocation10 + $0xc8] sm:$0xff]  ;;  %v138_v36 = vld [vmem:[#allocation10 + $0xd8] sm:$0xff]  ;;  %v1135_v38 = vpack.c.bf16 %v133_v34, %v131_v33  ;;  %v135_v39 = vld [vmem:[#allocation10 + $0xc0] sm:$0xff]  ;;  %p945_p5 = pnand %p944_p4, %p938_p1 }
  0x6e   :  { %559 = vmatprep.subr.bf16.mxu1 %v1109_v14  ;;  %v1139_v41 = vpack.c.bf16 %v138_v36, %v136_v35  ;;  %v137_v42 = vld [vmem:[#allocation10 + $0xd0] sm:$0xff]  ;;  %v140_v43 = vld [vmem:[#allocation10 + $0xe8] sm:$0xff]  ;;  %v100_v44 = vld [vmem:[#allocation6 + $0x8] sm:$0xff] }
  0x6f   :  { %v142_v45 = vld [vmem:[#allocation10 + $0xf8] sm:$0xff]  ;;  %v103_v46 = vmul.f32 %v1352_v37, %v100_v44  ;;  %v105_v47 = vld [vmem:[#allocation7 + $0x8] sm:$0xff]  ;;  %v246_v51 = vld [vmem:[#allocation12] sm:$0xff]  ;;  %v1146_v53 = vpack.c.bf16 %v137_v42, %v135_v39 }
  0x70   :  { %v247_v48 = vld [vmem:[#allocation12 + $0x8] sm:$0xff]  ;;  %v108_v49 = vmul.f32 %v1351_v40, %v105_v47  ;;  %v249_v50 = vld [vmem:[#allocation12 + $0x18] sm:$0xff]  ;;  %v248_v52 = vld [vmem:[#allocation12 + $0x10] sm:$0xff]  ;;  %v1151_v57 = vpack.c.bf16 %v142_v45, %v140_v43 }
  0x71   :  { %561 = vmatpush1.bf16.msra.mxu1 %v1112_v19  ;;  %v1148_v54 = vpack.c.bf16 %v249_v50, %v247_v48  ;;  %v251_v55 = vld [vmem:[#allocation12 + $0x28] sm:$0xff]  ;;  %v253_v56 = vld [vmem:[#allocation12 + $0x38] sm:$0xff]  ;;  %v139_v58 = vld [vmem:[#allocation10 + $0xe0] sm:$0xff]  ;;  %v1155_v62 = vpack.c.bf16 %v248_v52, %v246_v51 }
  0x72   :  { %563 = vmatprep.subr.bf16.mxu1 %v1115_v20  ;;  %v141_v59 = vld [vmem:[#allocation10 + $0xf0] sm:$0xff]  ;;  %v144_v60 = vld [vmem:[#allocation10 + $0x108] sm:$0xff]  ;;  %v1153_v61 = vadd.f32 %v108_v49, %v103_v46  ;;  %v146_v63 = vld [vmem:[#allocation10 + $0x118] sm:$0xff]  ;;  %v1157_v0 = vpack.c.bf16 %v253_v56, %v251_v55 }
  0x73   :  { %v250_v1 = vld [vmem:[#allocation12 + $0x20] sm:$0xff]  ;;  %v252_v2 = vld [vmem:[#allocation12 + $0x30] sm:$0xff]  ;;  %679 = vmatprep.subr.bf16.mxu0 %v1148_v54  ;;  %v255_v4 = vld [vmem:[#allocation12 + $0x48] sm:$0xff]  ;;  %v1163_v6 = vpack.c.bf16 %v141_v59, %v139_v58  ;;  %v1167_v9 = vpack.c.bf16 %v146_v63, %v144_v60 }
  0x74   :  { %239 = vmatprep.mubr.f32.mxu1 %v1153_v61  ;;  %v257_v5 = vld [vmem:[#allocation12 + $0x58] sm:$0xff]  ;;  %681 = vmatpush1.bf16.msra.mxu0 %v1155_v62  ;;  %v143_v10 = vld [vmem:[#allocation10 + $0x100] sm:$0xff]  ;;  %v145_v11 = vld [vmem:[#allocation10 + $0x110] sm:$0xff]  ;;  %v1169_v15 = vpack.c.bf16 %v252_v2, %v250_v1 }
  0x75   :  { %565 = vmatpush1.bf16.msra.mxu1 %v1120_v25  ;;  %683 = vmatprep.subr.bf16.mxu0 %v1157_v0  ;;  %v148_v12 = vld [vmem:[#allocation10 + $0x128] sm:$0xff]  ;;  %v150_v16 = vld [vmem:[#allocation10 + $0x138] sm:$0xff]  ;;  %v1171_v17 = vpack.c.bf16 %v257_v5, %v255_v4  ;;  %v254_v18 = vld [vmem:[#allocation12 + $0x40] sm:$0xff]  ;;  %v1175_v24 = vpack.c.bf16 %v145_v11, %v143_v10 }
  0x76   :  { %567 = vmatprep.subr.bf16.mxu1 %v1125_v26  ;;  %v256_v21 = vld [vmem:[#allocation12 + $0x50] sm:$0xff]  ;;  %v259_v22 = vld [vmem:[#allocation12 + $0x68] sm:$0xff]  ;;  %v261_v23 = vld [vmem:[#allocation12 + $0x78] sm:$0xff]  ;;  %v1179_v27 = vpack.c.bf16 %v150_v16, %v148_v12 }
  0x77   :  { %v147_v28 = vld [vmem:[#allocation10 + $0x120] sm:$0xff]  ;;  %v149_v29 = vld [vmem:[#allocation10 + $0x130] sm:$0xff]  ;;  %v152_v30 = vld [vmem:[#allocation10 + $0x148] sm:$0xff]  ;;  %v1181_v33 = vpack.c.bf16 %v256_v21, %v254_v18  ;;  %v1183_v35 = vpack.c.bf16 %v261_v23, %v259_v22 }
  0x78   :  { %685 = vmatpush1.bf16.msra.mxu0 %v1169_v15  ;;  %v154_v34 = vld [vmem:[#allocation10 + $0x158] sm:$0xff]  ;;  %v258_v36 = vld [vmem:[#allocation12 + $0x60] sm:$0xff]  ;;  %v260_v39 = vld [vmem:[#allocation12 + $0x70] sm:$0xff]  ;;  %v1187_v44 = vpack.c.bf16 %v149_v29, %v147_v28 }
  0x79   :  { %569 = vmatpush1.bf16.msra.mxu1 %v1128_v31  ;;  %687 = vmatprep.subr.bf16.mxu0 %v1171_v17  ;;  %v263_v42 = vld [vmem:[#allocation12 + $0x88] sm:$0xff]  ;;  %v265_v43 = vld [vmem:[#allocation12 + $0x98] sm:$0xff]  ;;  %v1191_v45 = vpack.c.bf16 %v154_v34, %v152_v30  ;;  %v151_v46 = vld [vmem:[#allocation10 + $0x140] sm:$0xff]  ;;  %v1193_v49 = vpack.c.bf16 %v260_v39, %v258_v36 }
  0x7a   :  { %571 = vmatprep.subr.bf16.mxu1 %v1131_v32  ;;  %v153_v47 = vld [vmem:[#allocation10 + $0x150] sm:$0xff]  ;;  %v156_v48 = vld [vmem:[#allocation10 + $0x168] sm:$0xff]  ;;  %v158_v50 = vld [vmem:[#allocation10 + $0x178] sm:$0xff]  ;;  %v1195_v51 = vpack.c.bf16 %v265_v43, %v263_v42 }
  0x7b   :  { %v262_v52 = vld [vmem:[#allocation12 + $0x80] sm:$0xff]  ;;  %v264_v55 = vld [vmem:[#allocation12 + $0x90] sm:$0xff]  ;;  %v267_v56 = vld [vmem:[#allocation12 + $0xa8] sm:$0xff]  ;;  %v1199_v59 = vpack.c.bf16 %v153_v47, %v151_v46  ;;  %v1203_v60 = vpack.c.bf16 %v158_v50, %v156_v48 }
  0x7c   :  { %689 = vmatpush1.bf16.msra.mxu0 %v1181_v33  ;;  %v269_v58 = vld [vmem:[#allocation12 + $0xb8] sm:$0xff]  ;;  %v155_v63 = vld [vmem:[#allocation10 + $0x160] sm:$0xff]  ;;  %v157_v1 = vld [vmem:[#allocation10 + $0x170] sm:$0xff]  ;;  %v1205_v4 = vpack.c.bf16 %v264_v55, %v262_v52 }
  0x7d   :  { %573 = vmatpush1.bf16.msra.mxu1 %v1135_v38  ;;  %691 = vmatprep.subr.bf16.mxu0 %v1183_v35  ;;  %v160_v2 = vld [vmem:[#allocation10 + $0x188] sm:$0xff]  ;;  %v162_v5 = vld [vmem:[#allocation10 + $0x198] sm:$0xff]  ;;  %v1207_v10 = vpack.c.bf16 %v269_v58, %v267_v56  ;;  %v266_v11 = vld [vmem:[#allocation12 + $0xa0] sm:$0xff]  ;;  %v1211_v21 = vpack.c.bf16 %v157_v1, %v155_v63 }
  0x7e   :  { %575 = vmatprep.subr.bf16.mxu1 %v1139_v41  ;;  %v268_v12 = vld [vmem:[#allocation12 + $0xb0] sm:$0xff]  ;;  %v271_v16 = vld [vmem:[#allocation12 + $0xc8] sm:$0xff]  ;;  %v273_v18 = vld [vmem:[#allocation12 + $0xd8] sm:$0xff]  ;;  %v1215_v22 = vpack.c.bf16 %v162_v5, %v160_v2 }
  0x7f   :  { %1359 = vst [vmem:[#allocation19_spill] sm:$0xff] %v1211_v21  ;;  %v159_v23 = vld [vmem:[#allocation10 + $0x180] sm:$0xff]  ;;  %v161_v28 = vld [vmem:[#allocation10 + $0x190] sm:$0xff]  ;;  %v164_v29 = vld [vmem:[#allocation10 + $0x1a8] sm:$0xff]  ;;  %v1217_v30 = vpack.c.bf16 %v268_v12, %v266_v11  ;;  %v1219_v36 = vpack.c.bf16 %v273_v18, %v271_v16 }
  0x80   :  { %693 = vmatpush1.bf16.msra.mxu0 %v1193_v49  ;;  %1360 = vst [vmem:[#allocation20_spill] sm:$0xff] %v1215_v22  ;;  %v166_v34 = vld [vmem:[#allocation10 + $0x1b8] sm:$0xff]  ;;  %v270_v39 = vld [vmem:[#allocation12 + $0xc0] sm:$0xff]  ;;  %v272_v42 = vld [vmem:[#allocation12 + $0xd0] sm:$0xff]  ;;  %v1223_v47 = vpack.c.bf16 %v161_v28, %v159_v23 }
  0x81   :  { %577 = vmatpush1.bf16.msra.mxu1 %v1146_v53  ;;  %695 = vmatprep.subr.bf16.mxu0 %v1195_v51  ;;  %v275_v43 = vld [vmem:[#allocation12 + $0xe8] sm:$0xff]  ;;  %v277_v46 = vld [vmem:[#allocation12 + $0xf8] sm:$0xff]  ;;  %v1227_v48 = vpack.c.bf16 %v166_v34, %v164_v29  ;;  %v163_v50 = vld [vmem:[#allocation10 + $0x1a0] sm:$0xff]  ;;  %v1229_v56 = vpack.c.bf16 %v272_v42, %v270_v39 }
  0x82   :  { %579 = vmatprep.subr.bf16.mxu1 %v1151_v57  ;;  %1361 = vst [vmem:[#allocation21_spill] sm:$0xff] %v1223_v47  ;;  %v165_v52 = vld [vmem:[#allocation10 + $0x1b0] sm:$0xff]  ;;  %v168_v55 = vld [vmem:[#allocation10 + $0x1c8] sm:$0xff]  ;;  %v170_v58 = vld [vmem:[#allocation10 + $0x1d8] sm:$0xff]  ;;  %v1231_v63 = vpack.c.bf16 %v277_v46, %v275_v43 }
  0x83   :  { %1362 = vst [vmem:[#allocation22_spill] sm:$0xff] %v1227_v48  ;;  %v274_v1 = vld [vmem:[#allocation12 + $0xe0] sm:$0xff]  ;;  %v276_v2 = vld [vmem:[#allocation12 + $0xf0] sm:$0xff]  ;;  %v279_v5 = vld [vmem:[#allocation12 + $0x108] sm:$0xff]  ;;  %v1235_v12 = vpack.c.bf16 %v165_v52, %v163_v50  ;;  %v1239_v16 = vpack.c.bf16 %v170_v58, %v168_v55 }
  0x84   :  { %697 = vmatpush1.bf16.msra.mxu0 %v1205_v4  ;;  %v281_v11 = vld [vmem:[#allocation12 + $0x118] sm:$0xff]  ;;  %v167_v18 = vld [vmem:[#allocation10 + $0x1c0] sm:$0xff]  ;;  %v169_v23 = vld [vmem:[#allocation10 + $0x1d0] sm:$0xff]  ;;  %v1241_v29 = vpack.c.bf16 %v276_v2, %v274_v1 }
  0x85   :  { %581 = vmatpush1.bf16.msra.mxu1 %v1163_v6  ;;  %699 = vmatprep.subr.bf16.mxu0 %v1207_v10  ;;  %1363 = vst [vmem:[#allocation23_spill] sm:$0xff] %v1235_v12  ;;  %v172_v28 = vld [vmem:[#allocation10 + $0x1e8] sm:$0xff]  ;;  %v174_v34 = vld [vmem:[#allocation10 + $0x1f8] sm:$0xff]  ;;  %v1243_v39 = vpack.c.bf16 %v281_v11, %v279_v5  ;;  %v278_v42 = vld [vmem:[#allocation12 + $0x100] sm:$0xff]  ;;  %v1247_v52 = vpack.c.bf16 %v169_v23, %v167_v18  ;;  %v1365_v18 = vstv %s1122_s2 }
  0x86   :  { %583 = vmatprep.subr.bf16.mxu1 %v1167_v9  ;;  %v280_v43 = vld [vmem:[#allocation12 + $0x110] sm:$0xff]  ;;  %v283_v46 = vld [vmem:[#allocation12 + $0x128] sm:$0xff]  ;;  %v285_v50 = vld [vmem:[#allocation12 + $0x138] sm:$0xff]  ;;  %v1251_v1 = vpack.c.bf16 %v174_v34, %v172_v28 }
  0x87   :  { %v99_v55 = vld [vmem:[#allocation6] sm:$0xff]  ;;  %v104_v58 = vld [vmem:[#allocation7] sm:$0xff]  ;;  %v1253_v11 = vpack.c.bf16 %v280_v43, %v278_v42  ;;  %v1255_v40 = vpack.c.bf16 %v285_v50, %v283_v46  ;;  %v291_v50 = vld [vmem:[#allocation12 + $0x168] sm:$0xff] }
  0x88   :  { %701 = vmatpush1.bf16.msra.mxu0 %v1217_v30  ;;  %v171_v2 = vld [vmem:[#allocation10 + $0x1e0] sm:$0xff]  ;;  %v173_v5 = vld [vmem:[#allocation10 + $0x1f0] sm:$0xff]  ;;  %v107_v23 = vmul.f32 %v1365_v18, %v104_v58 }
  0x89   :  { %585 = vmatpush1.bf16.msra.mxu1 %v1175_v24  ;;  %703 = vmatprep.subr.bf16.mxu0 %v1219_v36  ;;  %v282_v37 = vld [vmem:[#allocation12 + $0x120] sm:$0xff]  ;;  %v1263_v28 = vpack.c.bf16 %v173_v5, %v171_v2 }
  0x8a   :  { %587 = vmatprep.subr.bf16.mxu1 %v1179_v27  ;;  %v286_v43 = vld [vmem:[#allocation12 + $0x140] sm:$0xff] }
  0x8b   :  { %1366 = vst [vmem:[#allocation24_spill] sm:$0xff] %v1263_v28  ;;  %v290_v2 = vld [vmem:[#allocation12 + $0x160] sm:$0xff] }
  0x8c   :  { %705 = vmatpush1.bf16.msra.mxu0 %v1229_v56  ;;  %v294_v18 = vld [vmem:[#allocation12 + $0x180] sm:$0xff] }
  0x8d   :  { %589 = vmatpush1.bf16.msra.mxu1 %v1187_v44  ;;  %707 = vmatprep.subr.bf16.mxu0 %v1231_v63 }
  0x8e   :  { %591 = vmatprep.subr.bf16.mxu1 %v1191_v45 }
  0x90   :  { %709 = vmatpush1.bf16.msra.mxu0 %v1241_v29 }
  0x91   :  { %593 = vmatpush1.bf16.msra.mxu1 %v1199_v59  ;;  %711 = vmatprep.subr.bf16.mxu0 %v1243_v39 }
  0x92   :  { %595 = vmatprep.subr.bf16.mxu1 %v1203_v60 }
  0x94   :  { %713 = vmatpush1.bf16.msra.mxu0 %v1253_v11 }
  0x95   :  { %597 = vmatpush1.bf16.msra.mxu1 %v1211_v21  ;;  %v289_v21 = vld [vmem:[#allocation12 + $0x158] sm:$0xff]  ;;  %715 = vmatprep.subr.bf16.mxu0 %v1255_v40 }
  0x96   :  { %599 = vmatprep.subr.bf16.mxu1 %v1215_v22  ;;  %v287_v22 = vld [vmem:[#allocation12 + $0x148] sm:$0xff] }
  0x97   :  { %v1269_v42 = vpack.c.bf16 %v289_v21, %v287_v22  ;;  %v295_v22 = vld [vmem:[#allocation12 + $0x188] sm:$0xff] }
  0x99   :  { %601 = vmatpush1.bf16.msra.mxu1 %v1223_v47  ;;  %v1364_v47 = vstv %s1117_s5 }
  0x9a   :  { %603 = vmatprep.subr.bf16.mxu1 %v1227_v48  ;;  %v284_v48 = vld [vmem:[#allocation12 + $0x130] sm:$0xff] }
  0x9b   :  { %v1267_v34 = vpack.c.bf16 %v284_v48, %v282_v37  ;;  %v292_v37 = vld [vmem:[#allocation12 + $0x170] sm:$0xff]  ;;  %v297_v48 = vld [vmem:[#allocation12 + $0x198] sm:$0xff] }
  0x9c   :  { %v662_v5 = vpack.c.bf16 %v297_v48, %v295_v22  ;;  %v304_v22 = vld [vmem:[#allocation12 + $0x1d0] sm:$0xff]  ;;  %v309_v48 = vld [vmem:[#allocation12 + $0x1f8] sm:$0xff] }
  0x9d   :  { %605 = vmatpush1.bf16.msra.mxu1 %v1235_v12  ;;  %v102_v12 = vmul.f32 %v1364_v47, %v99_v55  ;;  %v288_v47 = vld [vmem:[#allocation12 + $0x150] sm:$0xff]  ;;  %717 = vmatpush1.bf16.msra.mxu0 %v1267_v34  ;;  %v293_v55 = vld [vmem:[#allocation12 + $0x178] sm:$0xff] }
  0x9e   :  { %607 = vmatprep.subr.bf16.mxu1 %v1239_v16  ;;  %719 = vmatprep.subr.bf16.mxu0 %v1269_v42  ;;  %v656_v58 = vpack.c.bf16 %v288_v47, %v286_v43  ;;  %v658_v21 = vpack.c.bf16 %v293_v55, %v291_v50  ;;  %v301_v43 = vld [vmem:[#allocation12 + $0x1b8] sm:$0xff]  ;;  %v300_v55 = vld [vmem:[#allocation12 + $0x1b0] sm:$0xff] }
  0x9f   :  { %v1271_v46 = vadd.f32 %v107_v23, %v102_v12  ;;  %v660_v12 = vpack.c.bf16 %v292_v37, %v290_v2  ;;  %v299_v23 = vld [vmem:[#allocation12 + $0x1a8] sm:$0xff]  ;;  %v302_v37 = vld [vmem:[#allocation12 + $0x1c0] sm:$0xff] }
  0xa0   :  { %v666_v50 = vpack.c.bf16 %v301_v43, %v299_v23  ;;  %v308_v23 = vld [vmem:[#allocation12 + $0x1f0] sm:$0xff] }
  0xa1   :  { %609 = vmatpush1.bf16.msra.mxu1 %v1247_v52  ;;  %721 = vmatpush1.bf16.msra.mxu0 %v656_v58 }
  0xa2   :  { %611 = vmatprep.subr.bf16.mxu1 %v1251_v1  ;;  %723 = vmatprep.subr.bf16.mxu0 %v658_v21 }
  0xa5   :  { %613 = vmatpush1.bf16.msra.mxu1 %v1263_v28  ;;  %725 = vmatpush1.bf16.msra.mxu0 %v660_v12  ;;  %v305_v28 = vld [vmem:[#allocation12 + $0x1d8] sm:$0xff] }
  0xa6   :  { %615 = vmatprep.subr.bf16.mxu1 %v1148_v54  ;;  %v296_v54 = vld [vmem:[#allocation12 + $0x190] sm:$0xff]  ;;  %727 = vmatprep.subr.bf16.mxu0 %v662_v5 }
  0xa7   :  { %v664_v47 = vpack.c.bf16 %v296_v54, %v294_v18  ;;  %v306_v54 = vld [vmem:[#allocation12 + $0x1e0] sm:$0xff] }
  0xa8   :  { %240 = vmatmul.mubr.f32.vlgmr.msra.gmra.mrb[0].mxu1 %v1271_v46 }
  0xa9   :  { %617 = vmatpush1.bf16.msra.mxu1 %v1155_v62  ;;  %374 = vmatprep.mubr.f32.mxu1 %v1153_v61  ;;  %v298_v62 = vld [vmem:[#allocation12 + $0x1a0] sm:$0xff]  ;;  %v303_v61 = vld [vmem:[#allocation12 + $0x1c8] sm:$0xff] }
  0xaa   :  { %619 = vmatprep.subr.bf16.mxu1 %v1157_v0  ;;  %729 = vmatpush1.bf16.msra.mxu0 %v664_v47  ;;  %v668_v0 = vpack.c.bf16 %v300_v55, %v298_v62  ;;  %v670_v2 = vpack.c.bf16 %v305_v28, %v303_v61 }
  0xab   :  { %731 = vmatprep.subr.bf16.mxu0 %v666_v50 }
  0xad   :  { %621 = vmatpush1.bf16.msra.mxu1 %v1169_v15  ;;  %v307_v15 = vld [vmem:[#allocation12 + $0x1e8] sm:$0xff] }
  0xae   :  { %623 = vmatprep.subr.bf16.mxu1 %v1171_v17  ;;  %733 = vmatpush1.bf16.msra.mxu0 %v668_v0  ;;  %v672_v17 = vpack.c.bf16 %v304_v22, %v302_v37  ;;  %v674_v18 = vpack.c.bf16 %v309_v48, %v307_v15 }
  0xaf   :  { %735 = vmatprep.subr.bf16.mxu0 %v670_v2 }
  0xb1   :  { %625 = vmatpush1.bf16.msra.mxu1 %v1181_v33  ;;  %v676_v33 = vpack.c.bf16 %v308_v23, %v306_v54 }
  0xb2   :  { %627 = vmatprep.subr.bf16.mxu1 %v1183_v35  ;;  %737 = vmatpush1.bf16.msra.mxu0 %v672_v17 }
  0xb3   :  { %739 = vmatprep.subr.bf16.mxu0 %v674_v18 }
  0xb5   :  { %629 = vmatpush1.bf16.msra.mxu1 %v1193_v49 }
  0xb6   :  { %631 = vmatprep.subr.bf16.mxu1 %v1195_v51  ;;  %741 = vmatpush1.bf16.msra.mxu0 %v676_v33 }
  0xb7   :  { %743 = vmatprep.subr.bf16.mxu0 %v1098_v3  ;;  %v381_v3 = vld [vmem:[#allocation9] sm:$0xff] }
  0xb9   :  { %633 = vmatpush1.bf16.msra.mxu1 %v1205_v4  ;;  %v382_v4 = vld [vmem:[#allocation9 + $0x8] sm:$0xff] }
  0xba   :  { %635 = vmatprep.subr.bf16.mxu1 %v1207_v10 }
  0xbd   :  { %637 = vmatpush1.bf16.msra.mxu1 %v1217_v30 }
  0xbe   :  { %639 = vmatprep.subr.bf16.mxu1 %v1219_v36 }
  0xc1   :  { %641 = vmatpush1.bf16.msra.mxu1 %v1229_v56 }
  0xc2   :  { %643 = vmatprep.subr.bf16.mxu1 %v1231_v63 }
  0xc5   :  { %645 = vmatpush1.bf16.msra.mxu1 %v1241_v29 }
  0xc6   :  { %647 = vmatprep.subr.bf16.mxu1 %v1243_v39 }
  0xc9   :  { %649 = vmatpush1.bf16.msra.mxu1 %v1253_v11 }
  0xca   :  { %651 = vmatprep.subr.bf16.mxu1 %v1255_v40 }
  0xcd   :  { %653 = vmatpush1.bf16.msra.mxu1 %v1267_v34 }
  0xce   :  { %655 = vmatprep.subr.bf16.mxu1 %v1269_v42 }
  0xd1   :  { %657 = vmatpush1.bf16.msra.mxu1 %v656_v58 }
  0xd2   :  { %659 = vmatprep.subr.bf16.mxu1 %v658_v21 }
  0xd5   :  { %661 = vmatpush1.bf16.msra.mxu1 %v660_v12 }
  0xd6   :  { %663 = vmatprep.subr.bf16.mxu1 %v662_v5 }
  0xd9   :  { %665 = vmatpush1.bf16.msra.mxu1 %v664_v47 }
  0xda   :  { %667 = vmatprep.subr.bf16.mxu1 %v666_v50 }
  0xdd   :  { %669 = vmatpush1.bf16.msra.mxu1 %v668_v0 }
  0xde   :  { %671 = vmatprep.subr.bf16.mxu1 %v670_v2 }
  0xe1   :  { %673 = vmatpush1.bf16.msra.mxu1 %v672_v17 }
  0xe2   :  { %675 = vmatprep.subr.bf16.mxu1 %v674_v18 }
  0xe5   :  { %677 = vmatpush1.bf16.msra.mxu1 %v676_v33 }
  0xe8   :  { %375 = vmatmul.mubr.f32.vlgmr.msra.gmra.mrb[2].mxu1 %v1271_v46 }
 0x17b   :  { %v241_v35 = vpop.f32.mrb[0].mxu1 }
 0x17c   :  { %v383_v40 = vmul.f32 %v381_v3, %v241_v35  ;;  %v243_v49 = vpop.f32.mrb[1].mxu1 }
 0x17d   :  { %v384_v56 = vmul.f32 %v382_v4, %v243_v49 }
 0x1bb   :  { %v376_v51 = vpop.f32.mrb[2].mxu1 }
 0x1bc   :  { %v378_v10 = vpop.f32.mrb[3].mxu1  ;;  %v385_v36 = vmul.f32 %v381_v3, %v376_v51 }
 0x1bd   :  { %v386_v30 = vmul.f32 %v382_v4, %v378_v10 }
 0x1bf   :  { %451 = vmatprep.mubr.f32.mxu0 %v386_v30 }
 0x1c0   :  { %452 = vmatmul.mubr.f32.vlgmr.msra.gmra.mrb[0].mxu0 %v385_v36 }
 0x1c1   :  { %745 = vmatpush1.bf16.msra.mxu0 %v1100_v7  ;;  %522 = vmatprep.mubr.f32.mxu0 %v384_v56  ;;  %v1367_v7 = vld [vmem:[#allocation19_spill] sm:$0xff] }
 0x1c2   :  { %747 = vmatprep.subr.bf16.mxu0 %v1102_v8  ;;  %v1368_v8 = vld [vmem:[#allocation20_spill] sm:$0xff] }
 0x1c5   :  { %749 = vmatpush1.bf16.msra.mxu0 %v1106_v13  ;;  %v1369_v13 = vld [vmem:[#allocation21_spill] sm:$0xff] }
 0x1c6   :  { %751 = vmatprep.subr.bf16.mxu0 %v1109_v14  ;;  %v1370_v14 = vld [vmem:[#allocation22_spill] sm:$0xff] }
 0x1c9   :  { %753 = vmatpush1.bf16.msra.mxu0 %v1112_v19  ;;  %v1371_v19 = vld [vmem:[#allocation23_spill] sm:$0xff] }
 0x1ca   :  { %755 = vmatprep.subr.bf16.mxu0 %v1115_v20  ;;  %v1372_v20 = vld [vmem:[#allocation24_spill] sm:$0xff] }
 0x1cd   :  { %757 = vmatpush1.bf16.msra.mxu0 %v1120_v25 }
 0x1ce   :  { %759 = vmatprep.subr.bf16.mxu0 %v1125_v26 }
 0x1d1   :  { %761 = vmatpush1.bf16.msra.mxu0 %v1128_v31 }
 0x1d2   :  { %763 = vmatprep.subr.bf16.mxu0 %v1131_v32 }
 0x1d5   :  { %765 = vmatpush1.bf16.msra.mxu0 %v1135_v38 }
 0x1d6   :  { %767 = vmatprep.subr.bf16.mxu0 %v1139_v41 }
 0x1d9   :  { %769 = vmatpush1.bf16.msra.mxu0 %v1146_v53 }
 0x1da   :  { %771 = vmatprep.subr.bf16.mxu0 %v1151_v57 }
 0x1dd   :  { %773 = vmatpush1.bf16.msra.mxu0 %v1163_v6 }
 0x1de   :  { %775 = vmatprep.subr.bf16.mxu0 %v1167_v9 }
 0x1e1   :  { %777 = vmatpush1.bf16.msra.mxu0 %v1175_v24 }
 0x1e2   :  { %779 = vmatprep.subr.bf16.mxu0 %v1179_v27 }
 0x1e5   :  { %781 = vmatpush1.bf16.msra.mxu0 %v1187_v44 }
 0x1e6   :  { %783 = vmatprep.subr.bf16.mxu0 %v1191_v45 }
 0x1e9   :  { %785 = vmatpush1.bf16.msra.mxu0 %v1199_v59 }
 0x1ea   :  { %787 = vmatprep.subr.bf16.mxu0 %v1203_v60 }
 0x1ed   :  { %789 = vmatpush1.bf16.msra.mxu0 %v1367_v7 }
 0x1ee   :  { %791 = vmatprep.subr.bf16.mxu0 %v1368_v8 }
 0x1f1   :  { %793 = vmatpush1.bf16.msra.mxu0 %v1369_v13 }
 0x1f2   :  { %795 = vmatprep.subr.bf16.mxu0 %v1370_v14 }
 0x1f5   :  { %797 = vmatpush1.bf16.msra.mxu0 %v1371_v19 }
 0x1f6   :  { %799 = vmatprep.subr.bf16.mxu0 %v1239_v16 }
 0x1f9   :  { %801 = vmatpush1.bf16.msra.mxu0 %v1247_v52 }
 0x1fa   :  { %803 = vmatprep.subr.bf16.mxu0 %v1251_v1 }
 0x1fd   :  { %805 = vmatpush1.bf16.msra.mxu0 %v1372_v20 }
 0x200   :  { %523 = vmatmul.mubr.f32.vlgmr.msra.gmra.mrb[0].mxu0 %v383_v40 }
 0x2d3   :  { %v524_v25 = vpop.f32.mrb[0].mxu0 }
 0x2d4   :  { %529 = vst [vmem:[#allocation13] sm:$0xff] %v524_v25  ;;  %v526_v26 = vpop.f32.mrb[1].mxu0 }
 0x2d5   :  { %530 = vst [vmem:[#allocation13 + $0x8] sm:$0xff] %v526_v26 }
 0x2d6   :  { %948 = shalt.err (!%p945_p5)
}
 0x2d7   :  { %s949_s20 = scalar_lea.hbm %s1350_s6, 256 }
 0x2d8   :  { %p950_p6 = scmp.ne.s32.totalorder %s1350_s6, %s949_s20  ;;  %p953_p7 = scmp.lt.u32.totalorder %s949_s20, %s1350_s6 }
 0x2da   :  { %p955_p8 = pnand %p953_p7, %p950_p6 }
 0x2dc   :  { %958 = shalt.err (!%p955_p8)
}
 0x2dd   :  { %540 = dma.vmem_to_hbm [thread:$0]  %s538_s16, 256, %s1350_s6, [#allocation4]  }
 0x2de   :  { %967 = dma.done.wait [#allocation4], 256  }
 0x2df   :  { %968 = vsyncadd [#allocation4], 4294967040 }
 0x2e0   :  { %544 = vsyncpa [#allocation3], 1 }
 0x2e1   :  { %545 = vsyncpa [#allocation8], 1 }
 0x2e2   :  { %546 = vsyncpa [#allocation11], 1 }
 0x2e3   :  { %547 = vsyncpa [#allocation4], 1 }
 0x2e4   :  { %548 = vsyncpa [#allocation5], 1 }

</bundles_post_ra>
